<compile_context>
chip_gen: v7x
topology: tpu7x:2x2x1
jax: 0.10.0
libtpu: 0.0.40
codegen_flags: <defaults>
</compile_context>

<pallas_src>
import functools

import jax
import jax.numpy as jnp
from jax.experimental import pallas as pl
from jax.experimental.pallas import tpu as pltpu


# ----------------------------- in-kernel helpers -----------------------------

def _layer_norm(x, gamma, beta, eps=1e-5):
    mean = jnp.mean(x, axis=-1, keepdims=True)
    var = jnp.mean((x - mean) ** 2, axis=-1, keepdims=True)
    return (x - mean) * jax.lax.rsqrt(var + eps) * gamma + beta


def _gelu_exact(x):
    # matches torch.nn.GELU() default (erf formulation)
    return 0.5 * x * (1.0 + jax.lax.erf(x * 0.7071067811865476))


# --------------------------------- kernel ------------------------------------

def attend_kernel(x_ref, ln1_g_ref, ln1_b_ref, wq_ref, wk_ref, wv_ref, wo_ref, bo_ref,
                  ln2_g_ref, ln2_b_ref, w1_ref, b1_ref, w2_ref, b2_ref,
                  o_ref, *, num_heads, head_dim):
    f32 = jnp.float32
    Bb, N, D = x_ref.shape
    H, Dh = num_heads, head_dim

    x = x_ref[...].reshape(Bb * N, D).astype(f32)

    # bf16 weights (cheap DMA) upcast once -> every dot is F32 x F32 = F32.
    wq = wq_ref[...].astype(f32)          # head_dim**-0.5 already folded in by the wrapper
    wk = wk_ref[...].astype(f32)
    wv = wv_ref[...].astype(f32)
    wo = wo_ref[...].astype(f32)
    w1 = w1_ref[...].astype(f32)
    w2 = w2_ref[...].astype(f32)

    # ---- PreNorm(Attention) ----
    y = _layer_norm(x, ln1_g_ref[...], ln1_b_ref[...])
    q = jnp.dot(y, wq, preferred_element_type=f32)          # (Bb*N, H*Dh), pre-scaled
    k = jnp.dot(y, wk, preferred_element_type=f32)
    v = jnp.dot(y, wv, preferred_element_type=f32)

    def split_heads(t):
        # (Bb*N, H*Dh) -> (Bb*H, N, Dh): leading-dim reshape + axes(1,2) swap.
        # The minor (lane) dim stays minor; no full lane<->sublane transpose through the XLU.
        return t.reshape(Bb, N, H, Dh).swapaxes(1, 2).reshape(Bb * H, N, Dh)

    qh, kh, vh = split_heads(q), split_heads(k), split_heads(v)

    # (batch*head)-batched attention core: canonical batched matmuls (no khT transpose).
    sim = jnp.einsum("bnd,bmd->bnm", qh, kh, preferred_element_type=f32)     # (Bb*H, N, N)
    sim = sim - jnp.max(sim, axis=-1, keepdims=True)
    p = jnp.exp(sim)
    l = jnp.sum(p, axis=-1, keepdims=True)                                   # (Bb*H, N, 1)
    out = jnp.einsum("bnm,bmd->bnd", p, vh, preferred_element_type=f32)      # (Bb*H, N, Dh)
    # flash-style: normalize the small (N, Dh) result, not the (N, N) prob matrix
    out = out * pl.reciprocal(l, approx=True)

    # merge heads, then a single K = H*Dh projection (head reduction happens on the MXU)
    merged = out.reshape(Bb, H, N, Dh).swapaxes(1, 2).reshape(Bb * N, H * Dh)
    x1 = x + jnp.dot(merged, wo, preferred_element_type=f32) + bo_ref[...]   # residual 1

    # ---- PreNorm(FeedForward) ----
    z = _layer_norm(x1, ln2_g_ref[...], ln2_b_ref[...])
    h1 = _gelu_exact(jnp.dot(z, w1, preferred_element_type=f32) + b1_ref[...])
    x2 = x1 + jnp.dot(h1, w2, preferred_element_type=f32) + b2_ref[...]      # residual 2

    o_ref[...] = x2.reshape(Bb, N, D).astype(o_ref.dtype)


# -------------------------------- wrapper -------------------------------------

def attend_forward(x, params, *, num_heads, head_dim, batch_block=1,
                   vmem_limit_bytes=48 * 1024 * 1024):
    B, N, D = x.shape
    assert B % batch_block == 0, "batch must be divisible by batch_block"
    inner = num_heads * head_dim
    F = params["w1"].shape[1]
    bf16 = jnp.bfloat16
    scale = head_dim ** -0.5

    # weights shipped in bf16 (halves DMA bytes); q scale folded into Wq once here.
    wq = (params["wq"].astype(jnp.float32) * scale).astype(bf16)
    wk = params["wk"].astype(bf16)
    wv = params["wv"].astype(bf16)
    wo = params["wo"].astype(bf16)
    w1 = params["w1"].astype(bf16)
    w2 = params["w2"].astype(bf16)

    kernel = functools.partial(attend_kernel, num_heads=num_heads, head_dim=head_dim)

    def const_spec(shape):
        # whole-array block, constant across the grid -> single-buffered (Buffered(1));
        # double-buffering a block whose index never changes only doubles VMEM use.
        n = len(shape)
        return pl.BlockSpec(shape, lambda b, _n=n: (0,) * _n,
                            pipeline_mode=pl.Buffered(1))

    in_specs = [
        pl.BlockSpec((batch_block, N, D), lambda b: (b, 0, 0)),            # x (streamed)
        const_spec((1, D)), const_spec((1, D)),                            # ln1 gamma / beta
        const_spec((D, inner)),                                            # Wq (pre-scaled)
        const_spec((D, inner)),                                            # Wk
        const_spec((D, inner)),                                            # Wv
        const_spec((inner, D)), const_spec((1, D)),                        # Wo, bo
        const_spec((1, D)), const_spec((1, D)),                            # ln2 gamma / beta
        const_spec((D, F)), const_spec((1, F)),                            # W1, b1
        const_spec((F, D)), const_spec((1, D)),                            # W2, b2
    ]

    return pl.pallas_call(
        kernel,
        out_shape=jax.ShapeDtypeStruct((B, N, D), x.dtype),
        grid_spec=pltpu.PrefetchScalarGridSpec(
            num_scalar_prefetch=0,
            grid=(B // batch_block,),
            in_specs=in_specs,
            out_specs=pl.BlockSpec((batch_block, N, D), lambda b: (b, 0, 0)),
        ),
        compiler_params=pltpu.CompilerParams(
            dimension_semantics=("parallel",),
            vmem_limit_bytes=vmem_limit_bytes,
        ),
    )(
        x,
        params["ln1_g"], params["ln1_b"],
        wq, wk, wv, wo, params["bo"],
        params["ln2_g"], params["ln2_b"],
        w1, params["b1"], w2, params["b2"],
    )


# ------------------------- pure-JAX reference (sanity) -------------------------

def attend_reference(x, params, *, num_heads, head_dim):
    scale = head_dim ** -0.5

    def ln(t, g, b):
        m = jnp.mean(t, axis=-1, keepdims=True)
        v = jnp.mean((t - m) ** 2, axis=-1, keepdims=True)
        return (t - m) / jnp.sqrt(v + 1e-5) * g + b

    y = ln(x, params["ln1_g"], params["ln1_b"])
    q, k, v = y @ params["wq"], y @ params["wk"], y @ params["wv"]

    def split_heads(t):
        B, N, _ = t.shape
        return t.reshape(B, N, num_heads, head_dim).transpose(0, 2, 1, 3)

    qh, kh, vh = map(split_heads, (q, k, v))
    sim = jnp.einsum("bhid,bhjd->bhij", qh, kh) * scale
    attn = jax.nn.softmax(sim, axis=-1)
    out = jnp.einsum("bhij,bhjd->bhid", attn, vh)
    out = out.transpose(0, 2, 1, 3).reshape(x.shape[0], x.shape[1], num_heads * head_dim)
    x1 = x + (out @ params["wo"] + params["bo"])

    z = ln(x1, params["ln2_g"], params["ln2_b"])
    pre = z @ params["w1"] + params["b1"]
    h1 = 0.5 * pre * (1.0 + jax.lax.erf(pre * 0.7071067811865476))
    return x1 + (h1 @ params["w2"] + params["b2"])


# ----------------------------------- main --------------------------------------

if __name__ == "__main__":
    # small shapes consistent with the module
    B, N = 2, 8              # batch, sequence length
    D = 32                   # query_dim
    H, Dh = 4, 16            # num_heads, head_dim
    F = 64                   # ff_hidden_dim
    inner = H * Dh

    key = jax.random.PRNGKey(0)
    ks = jax.random.split(key, 8)
    s = 0.02
    params = {
        "ln1_g": jnp.ones((1, D), jnp.float32),
        "ln1_b": jnp.zeros((1, D), jnp.float32),
        "wq":  s * jax.random.normal(ks[0], (D, inner), jnp.float32),
        "wk":  s * jax.random.normal(ks[1], (D, inner), jnp.float32),
        "wv":  s * jax.random.normal(ks[2], (D, inner), jnp.float32),
        "wo":  s * jax.random.normal(ks[3], (inner, D), jnp.float32),
        "bo":  jnp.zeros((1, D), jnp.float32),
        "ln2_g": jnp.ones((1, D), jnp.float32),
        "ln2_b": jnp.zeros((1, D), jnp.float32),
        "w1":  s * jax.random.normal(ks[4], (D, F), jnp.float32),
        "b1":  jnp.zeros((1, F), jnp.float32),
        "w2":  s * jax.random.normal(ks[5], (F, D), jnp.float32),
        "b2":  jnp.zeros((1, D), jnp.float32),
    }

    x = jax.random.normal(ks[6], (B, N, D), jnp.float32)

    out = attend_forward(x, params, num_heads=H, head_dim=Dh, batch_block=1)
    out = jax.block_until_ready(out)

    ref = jax.block_until_ready(attend_reference(x, params, num_heads=H, head_dim=Dh))
    assert out.shape == (B, N, D)
    # bf16-shipped weights + approx reciprocal in the softmax denominator -> loose tolerance
    assert jnp.allclose(out, ref, atol=2e-2, rtol=2e-2), "Pallas output mismatch vs JAX reference"

    print("KERNEL_OK")
</pallas_src>

<mosaic_0001>
module attributes {stable_mosaic.version = 11 : i64} {
  func.func @attend_kernel(%arg0: i32, %arg1: memref<1x8x32xf32, #tpu.memory_space<vmem>>, %arg2: memref<1x32xf32, #tpu.memory_space<vmem>>, %arg3: memref<1x32xf32, #tpu.memory_space<vmem>>, %arg4: memref<32x64xbf16, #tpu.memory_space<vmem>>, %arg5: memref<32x64xbf16, #tpu.memory_space<vmem>>, %arg6: memref<32x64xbf16, #tpu.memory_space<vmem>>, %arg7: memref<64x32xbf16, #tpu.memory_space<vmem>>, %arg8: memref<1x32xf32, #tpu.memory_space<vmem>>, %arg9: memref<1x32xf32, #tpu.memory_space<vmem>>, %arg10: memref<1x32xf32, #tpu.memory_space<vmem>>, %arg11: memref<32x64xbf16, #tpu.memory_space<vmem>>, %arg12: memref<1x64xf32, #tpu.memory_space<vmem>>, %arg13: memref<64x32xbf16, #tpu.memory_space<vmem>>, %arg14: memref<1x32xf32, #tpu.memory_space<vmem>>, %arg15: memref<1x8x32xf32, #tpu.memory_space<vmem>>) attributes {dimension_semantics = [#tpu.dimension_semantics<parallel>], iteration_bounds = array<i64: 2>, scalar_prefetch = 0 : i64, scratch_operands = 0 : i64, tpu.core_type = #tpu.core_type<tc>, window_params = [{transform_indices = @transform_0, window_bounds = array<i64: 1, 8, 32>}, {pipeline_mode = #tpu.pipeline_mode<synchronous>, transform_indices = @transform_1, window_bounds = array<i64: 1, 32>}, {pipeline_mode = #tpu.pipeline_mode<synchronous>, transform_indices = @transform_2, window_bounds = array<i64: 1, 32>}, {pipeline_mode = #tpu.pipeline_mode<synchronous>, transform_indices = @transform_3, window_bounds = array<i64: 32, 64>}, {pipeline_mode = #tpu.pipeline_mode<synchronous>, transform_indices = @transform_4, window_bounds = array<i64: 32, 64>}, {pipeline_mode = #tpu.pipeline_mode<synchronous>, transform_indices = @transform_5, window_bounds = array<i64: 32, 64>}, {pipeline_mode = #tpu.pipeline_mode<synchronous>, transform_indices = @transform_6, window_bounds = array<i64: 64, 32>}, {pipeline_mode = #tpu.pipeline_mode<synchronous>, transform_indices = @transform_7, window_bounds = array<i64: 1, 32>}, {pipeline_mode = #tpu.pipeline_mode<synchronous>, transform_indices = @transform_8, window_bounds = array<i64: 1, 32>}, {pipeline_mode = #tpu.pipeline_mode<synchronous>, transform_indices = @transform_9, window_bounds = array<i64: 1, 32>}, {pipeline_mode = #tpu.pipeline_mode<synchronous>, transform_indices = @transform_10, window_bounds = array<i64: 32, 64>}, {pipeline_mode = #tpu.pipeline_mode<synchronous>, transform_indices = @transform_11, window_bounds = array<i64: 1, 64>}, {pipeline_mode = #tpu.pipeline_mode<synchronous>, transform_indices = @transform_12, window_bounds = array<i64: 64, 32>}, {pipeline_mode = #tpu.pipeline_mode<synchronous>, transform_indices = @transform_13, window_bounds = array<i64: 1, 32>}, {transform_indices = @transform_14, window_bounds = array<i64: 1, 8, 32>}]} {
    %c0 = arith.constant 0 : index
    %c0_0 = arith.constant 0 : index
    %c0_1 = arith.constant 0 : index
    %0 = vector.load %arg1[%c0, %c0_0, %c0_1] : memref<1x8x32xf32, #tpu.memory_space<vmem>>, vector<1x8x32xf32>
    %1 = vector.shape_cast %0 : vector<1x8x32xf32> to vector<8x32xf32>
    %c0_2 = arith.constant 0 : index
    %c0_3 = arith.constant 0 : index
    %2 = vector.load %arg4[%c0_2, %c0_3] : memref<32x64xbf16, #tpu.memory_space<vmem>>, vector<32x64xbf16>
    %3 = arith.extf %2 : vector<32x64xbf16> to vector<32x64xf32>
    %c0_4 = arith.constant 0 : index
    %c0_5 = arith.constant 0 : index
    %4 = vector.load %arg5[%c0_4, %c0_5] : memref<32x64xbf16, #tpu.memory_space<vmem>>, vector<32x64xbf16>
    %5 = arith.extf %4 : vector<32x64xbf16> to vector<32x64xf32>
    %c0_6 = arith.constant 0 : index
    %c0_7 = arith.constant 0 : index
    %6 = vector.load %arg6[%c0_6, %c0_7] : memref<32x64xbf16, #tpu.memory_space<vmem>>, vector<32x64xbf16>
    %7 = arith.extf %6 : vector<32x64xbf16> to vector<32x64xf32>
    %c0_8 = arith.constant 0 : index
    %c0_9 = arith.constant 0 : index
    %8 = vector.load %arg7[%c0_8, %c0_9] : memref<64x32xbf16, #tpu.memory_space<vmem>>, vector<64x32xbf16>
    %9 = arith.extf %8 : vector<64x32xbf16> to vector<64x32xf32>
    %c0_10 = arith.constant 0 : index
    %c0_11 = arith.constant 0 : index
    %10 = vector.load %arg11[%c0_10, %c0_11] : memref<32x64xbf16, #tpu.memory_space<vmem>>, vector<32x64xbf16>
    %11 = arith.extf %10 : vector<32x64xbf16> to vector<32x64xf32>
    %c0_12 = arith.constant 0 : index
    %c0_13 = arith.constant 0 : index
    %12 = vector.load %arg13[%c0_12, %c0_13] : memref<64x32xbf16, #tpu.memory_space<vmem>>, vector<64x32xbf16>
    %13 = arith.extf %12 : vector<64x32xbf16> to vector<64x32xf32>
    %c0_14 = arith.constant 0 : index
    %c0_15 = arith.constant 0 : index
    %14 = vector.load %arg2[%c0_14, %c0_15] : memref<1x32xf32, #tpu.memory_space<vmem>>, vector<1x32xf32>
    %c0_16 = arith.constant 0 : index
    %c0_17 = arith.constant 0 : index
    %15 = vector.load %arg3[%c0_16, %c0_17] : memref<1x32xf32, #tpu.memory_space<vmem>>, vector<1x32xf32>
    %cst = arith.constant dense<0.000000e+00> : vector<8xf32>
    %16 = vector.multi_reduction <add>, %1, %cst [1] : vector<8x32xf32> to vector<8xf32>
    %17 = vector.shape_cast %16 : vector<8xf32> to vector<8x1xf32>
    %cst_18 = arith.constant 3.200000e+01 : f32
    %18 = vector.broadcast %cst_18 : f32 to vector<8x1xf32>
    %19 = arith.divf %17, %18 : vector<8x1xf32>
    %20 = vector.broadcast %19 : vector<8x1xf32> to vector<8x32xf32>
    %21 = arith.subf %1, %20 : vector<8x32xf32>
    %22 = arith.mulf %21, %21 : vector<8x32xf32>
    %cst_19 = arith.constant dense<0.000000e+00> : vector<8xf32>
    %23 = vector.multi_reduction <add>, %22, %cst_19 [1] : vector<8x32xf32> to vector<8xf32>
    %24 = vector.shape_cast %23 : vector<8xf32> to vector<8x1xf32>
    %cst_20 = arith.constant 3.200000e+01 : f32
    %25 = vector.broadcast %cst_20 : f32 to vector<8x1xf32>
    %26 = arith.divf %24, %25 : vector<8x1xf32>
    %27 = vector.broadcast %19 : vector<8x1xf32> to vector<8x32xf32>
    %28 = arith.subf %1, %27 : vector<8x32xf32>
    %cst_21 = arith.constant 9.99999974E-6 : f32
    %29 = vector.broadcast %cst_21 : f32 to vector<8x1xf32>
    %30 = arith.addf %26, %29 : vector<8x1xf32>
    %31 = math.rsqrt %30 : vector<8x1xf32>
    %32 = vector.broadcast %31 : vector<8x1xf32> to vector<8x32xf32>
    %33 = arith.mulf %28, %32 : vector<8x32xf32>
    %34 = vector.broadcast %14 : vector<1x32xf32> to vector<8x32xf32>
    %35 = arith.mulf %33, %34 : vector<8x32xf32>
    %36 = vector.broadcast %15 : vector<1x32xf32> to vector<8x32xf32>
    %37 = arith.addf %35, %36 : vector<8x32xf32>
    %cst_22 = arith.constant dense<0.000000e+00> : vector<8x64xf32>
    %38 = tpu.matmul %37, %3, %cst_22 {dimension_numbers = #tpu.dot_dimension_numbers<[1], [0], [0], [1], [0, 0, 1, 1], [], []>} : vector<8x32xf32>, vector<32x64xf32>, vector<8x64xf32> -> vector<8x64xf32>
    %cst_23 = arith.constant dense<0.000000e+00> : vector<8x64xf32>
    %39 = tpu.matmul %37, %5, %cst_23 {dimension_numbers = #tpu.dot_dimension_numbers<[1], [0], [0], [1], [0, 0, 1, 1], [], []>} : vector<8x32xf32>, vector<32x64xf32>, vector<8x64xf32> -> vector<8x64xf32>
    %cst_24 = arith.constant dense<0.000000e+00> : vector<8x64xf32>
    %40 = tpu.matmul %37, %7, %cst_24 {dimension_numbers = #tpu.dot_dimension_numbers<[1], [0], [0], [1], [0, 0, 1, 1], [], []>} : vector<8x32xf32>, vector<32x64xf32>, vector<8x64xf32> -> vector<8x64xf32>
    %41 = vector.shape_cast %38 : vector<8x64xf32> to vector<1x8x4x16xf32>
    %42 = tpu.transpose %41, [0, 2, 1, 3] : vector<1x8x4x16xf32> -> vector<1x4x8x16xf32>
    %43 = vector.shape_cast %42 : vector<1x4x8x16xf32> to vector<4x8x16xf32>
    %44 = vector.shape_cast %39 : vector<8x64xf32> to vector<1x8x4x16xf32>
    %45 = tpu.transpose %44, [0, 2, 1, 3] : vector<1x8x4x16xf32> -> vector<1x4x8x16xf32>
    %46 = vector.shape_cast %45 : vector<1x4x8x16xf32> to vector<4x8x16xf32>
    %47 = vector.shape_cast %40 : vector<8x64xf32> to vector<1x8x4x16xf32>
    %48 = tpu.transpose %47, [0, 2, 1, 3] : vector<1x8x4x16xf32> -> vector<1x4x8x16xf32>
    %49 = vector.shape_cast %48 : vector<1x4x8x16xf32> to vector<4x8x16xf32>
    "tpu.trace_start"() <{level = 10 : i32, message = "bnd,bmd->bnm"}> : () -> ()
    %cst_25 = arith.constant dense<0.000000e+00> : vector<4x8x8xf32>
    %50 = tpu.matmul %43, %46, %cst_25 {dimension_numbers = #tpu.dot_dimension_numbers<[2], [2], [1], [1], [0, 0, 0, 1, 1, 1], [0], [0]>} : vector<4x8x16xf32>, vector<4x8x16xf32>, vector<4x8x8xf32> -> vector<4x8x8xf32>
    "tpu.trace_stop"() : () -> ()
    %cst_26 = arith.constant dense<0xFF800000> : vector<4x8xf32>
    %51 = vector.multi_reduction <maximumf>, %50, %cst_26 [2] : vector<4x8x8xf32> to vector<4x8xf32>
    %52 = vector.shape_cast %51 : vector<4x8xf32> to vector<4x8x1xf32>
    %53 = vector.broadcast %52 : vector<4x8x1xf32> to vector<4x8x8xf32>
    %54 = arith.subf %50, %53 : vector<4x8x8xf32>
    %55 = math.exp %54 : vector<4x8x8xf32>
    %cst_27 = arith.constant dense<0.000000e+00> : vector<4x8xf32>
    %56 = vector.multi_reduction <add>, %55, %cst_27 [2] : vector<4x8x8xf32> to vector<4x8xf32>
    %57 = vector.shape_cast %56 : vector<4x8xf32> to vector<4x8x1xf32>
    "tpu.trace_start"() <{level = 10 : i32, message = "bnm,bmd->bnd"}> : () -> ()
    %cst_28 = arith.constant dense<0.000000e+00> : vector<4x8x16xf32>
    %58 = tpu.matmul %55, %49, %cst_28 {dimension_numbers = #tpu.dot_dimension_numbers<[2], [1], [1], [2], [0, 0, 0, 1, 1, 2], [0], [0]>} : vector<4x8x8xf32>, vector<4x8x16xf32>, vector<4x8x16xf32> -> vector<4x8x16xf32>
    "tpu.trace_stop"() : () -> ()
    %59 = tpu.reciprocal %57 {approx = true} : vector<4x8x1xf32> -> vector<4x8x1xf32>
    %60 = vector.broadcast %59 : vector<4x8x1xf32> to vector<4x8x16xf32>
    %61 = arith.mulf %58, %60 : vector<4x8x16xf32>
    %62 = vector.shape_cast %61 : vector<4x8x16xf32> to vector<1x4x8x16xf32>
    %63 = tpu.transpose %62, [0, 2, 1, 3] : vector<1x4x8x16xf32> -> vector<1x8x4x16xf32>
    %64 = vector.shape_cast %63 : vector<1x8x4x16xf32> to vector<8x64xf32>
    %cst_29 = arith.constant dense<0.000000e+00> : vector<8x32xf32>
    %65 = tpu.matmul %64, %9, %cst_29 {dimension_numbers = #tpu.dot_dimension_numbers<[1], [0], [0], [1], [0, 0, 1, 1], [], []>} : vector<8x64xf32>, vector<64x32xf32>, vector<8x32xf32> -> vector<8x32xf32>
    %66 = arith.addf %1, %65 : vector<8x32xf32>
    %c0_30 = arith.constant 0 : index
    %c0_31 = arith.constant 0 : index
    %67 = vector.load %arg8[%c0_30, %c0_31] : memref<1x32xf32, #tpu.memory_space<vmem>>, vector<1x32xf32>
    %68 = vector.broadcast %67 : vector<1x32xf32> to vector<8x32xf32>
    %69 = arith.addf %66, %68 : vector<8x32xf32>
    %c0_32 = arith.constant 0 : index
    %c0_33 = arith.constant 0 : index
    %70 = vector.load %arg9[%c0_32, %c0_33] : memref<1x32xf32, #tpu.memory_space<vmem>>, vector<1x32xf32>
    %c0_34 = arith.constant 0 : index
    %c0_35 = arith.constant 0 : index
    %71 = vector.load %arg10[%c0_34, %c0_35] : memref<1x32xf32, #tpu.memory_space<vmem>>, vector<1x32xf32>
    %cst_36 = arith.constant dense<0.000000e+00> : vector<8xf32>
    %72 = vector.multi_reduction <add>, %69, %cst_36 [1] : vector<8x32xf32> to vector<8xf32>
    %73 = vector.shape_cast %72 : vector<8xf32> to vector<8x1xf32>
    %cst_37 = arith.constant 3.200000e+01 : f32
    %74 = vector.broadcast %cst_37 : f32 to vector<8x1xf32>
    %75 = arith.divf %73, %74 : vector<8x1xf32>
    %76 = vector.broadcast %75 : vector<8x1xf32> to vector<8x32xf32>
    %77 = arith.subf %69, %76 : vector<8x32xf32>
    %78 = arith.mulf %77, %77 : vector<8x32xf32>
    %cst_38 = arith.constant dense<0.000000e+00> : vector<8xf32>
    %79 = vector.multi_reduction <add>, %78, %cst_38 [1] : vector<8x32xf32> to vector<8xf32>
    %80 = vector.shape_cast %79 : vector<8xf32> to vector<8x1xf32>
    %cst_39 = arith.constant 3.200000e+01 : f32
    %81 = vector.broadcast %cst_39 : f32 to vector<8x1xf32>
    %82 = arith.divf %80, %81 : vector<8x1xf32>
    %83 = vector.broadcast %75 : vector<8x1xf32> to vector<8x32xf32>
    %84 = arith.subf %69, %83 : vector<8x32xf32>
    %cst_40 = arith.constant 9.99999974E-6 : f32
    %85 = vector.broadcast %cst_40 : f32 to vector<8x1xf32>
    %86 = arith.addf %82, %85 : vector<8x1xf32>
    %87 = math.rsqrt %86 : vector<8x1xf32>
    %88 = vector.broadcast %87 : vector<8x1xf32> to vector<8x32xf32>
    %89 = arith.mulf %84, %88 : vector<8x32xf32>
    %90 = vector.broadcast %70 : vector<1x32xf32> to vector<8x32xf32>
    %91 = arith.mulf %89, %90 : vector<8x32xf32>
    %92 = vector.broadcast %71 : vector<1x32xf32> to vector<8x32xf32>
    %93 = arith.addf %91, %92 : vector<8x32xf32>
    %cst_41 = arith.constant dense<0.000000e+00> : vector<8x64xf32>
    %94 = tpu.matmul %93, %11, %cst_41 {dimension_numbers = #tpu.dot_dimension_numbers<[1], [0], [0], [1], [0, 0, 1, 1], [], []>} : vector<8x32xf32>, vector<32x64xf32>, vector<8x64xf32> -> vector<8x64xf32>
    %c0_42 = arith.constant 0 : index
    %c0_43 = arith.constant 0 : index
    %95 = vector.load %arg12[%c0_42, %c0_43] : memref<1x64xf32, #tpu.memory_space<vmem>>, vector<1x64xf32>
    %96 = vector.broadcast %95 : vector<1x64xf32> to vector<8x64xf32>
    %97 = arith.addf %94, %96 : vector<8x64xf32>
    %cst_44 = arith.constant 5.000000e-01 : f32
    %98 = vector.broadcast %cst_44 : f32 to vector<8x64xf32>
    %99 = arith.mulf %98, %97 : vector<8x64xf32>
    %cst_45 = arith.constant 0.707106769 : f32
    %100 = vector.broadcast %cst_45 : f32 to vector<8x64xf32>
    %101 = arith.mulf %97, %100 : vector<8x64xf32>
    %102 = math.erf %101 : vector<8x64xf32>
    %cst_46 = arith.constant 1.000000e+00 : f32
    %103 = vector.broadcast %cst_46 : f32 to vector<8x64xf32>
    %104 = arith.addf %103, %102 : vector<8x64xf32>
    %105 = arith.mulf %99, %104 : vector<8x64xf32>
    %cst_47 = arith.constant dense<0.000000e+00> : vector<8x32xf32>
    %106 = tpu.matmul %105, %13, %cst_47 {dimension_numbers = #tpu.dot_dimension_numbers<[1], [0], [0], [1], [0, 0, 1, 1], [], []>} : vector<8x64xf32>, vector<64x32xf32>, vector<8x32xf32> -> vector<8x32xf32>
    %107 = arith.addf %69, %106 : vector<8x32xf32>
    %c0_48 = arith.constant 0 : index
    %c0_49 = arith.constant 0 : index
    %108 = vector.load %arg14[%c0_48, %c0_49] : memref<1x32xf32, #tpu.memory_space<vmem>>, vector<1x32xf32>
    %109 = vector.broadcast %108 : vector<1x32xf32> to vector<8x32xf32>
    %110 = arith.addf %107, %109 : vector<8x32xf32>
    %111 = vector.shape_cast %110 : vector<8x32xf32> to vector<1x8x32xf32>
    %c0_50 = arith.constant 0 : index
    %c0_51 = arith.constant 0 : index
    %c0_52 = arith.constant 0 : index
    %112 = vector.load %arg15[%c0_50, %c0_51, %c0_52] : memref<1x8x32xf32, #tpu.memory_space<vmem>>, vector<1x8x32xf32>
    tpu.vector_store %arg15[%c0_50, %c0_51, %c0_52], %111 {strides = array<i32>} : memref<1x8x32xf32, #tpu.memory_space<vmem>>, vector<1x8x32xf32>,
    return
  }
  func.func @transform_0(%arg0: i32) -> (i32, i32, i32) {
    %c0_i32 = arith.constant 0 : i32
    %c0_i32_0 = arith.constant 0 : i32
    %c0_i32_1 = arith.constant 0 : i32
    return %arg0, %c0_i32, %c0_i32_0 : i32, i32, i32
  }
  func.func @transform_1(%arg0: i32) -> (i32, i32) {
    %c0_i32 = arith.constant 0 : i32
    %c0_i32_0 = arith.constant 0 : i32
    %c0_i32_1 = arith.constant 0 : i32
    return %c0_i32, %c0_i32_0 : i32, i32
  }
  func.func @transform_2(%arg0: i32) -> (i32, i32) {
    %c0_i32 = arith.constant 0 : i32
    %c0_i32_0 = arith.constant 0 : i32
    %c0_i32_1 = arith.constant 0 : i32
    return %c0_i32, %c0_i32_0 : i32, i32
  }
  func.func @transform_3(%arg0: i32) -> (i32, i32) {
    %c0_i32 = arith.constant 0 : i32
    %c0_i32_0 = arith.constant 0 : i32
    %c0_i32_1 = arith.constant 0 : i32
    return %c0_i32, %c0_i32_0 : i32, i32
  }
  func.func @transform_4(%arg0: i32) -> (i32, i32) {
    %c0_i32 = arith.constant 0 : i32
    %c0_i32_0 = arith.constant 0 : i32
    %c0_i32_1 = arith.constant 0 : i32
    return %c0_i32, %c0_i32_0 : i32, i32
  }
  func.func @transform_5(%arg0: i32) -> (i32, i32) {
    %c0_i32 = arith.constant 0 : i32
    %c0_i32_0 = arith.constant 0 : i32
    %c0_i32_1 = arith.constant 0 : i32
    return %c0_i32, %c0_i32_0 : i32, i32
  }
  func.func @transform_6(%arg0: i32) -> (i32, i32) {
    %c0_i32 = arith.constant 0 : i32
    %c0_i32_0 = arith.constant 0 : i32
    %c0_i32_1 = arith.constant 0 : i32
    return %c0_i32, %c0_i32_0 : i32, i32
  }
  func.func @transform_7(%arg0: i32) -> (i32, i32) {
    %c0_i32 = arith.constant 0 : i32
    %c0_i32_0 = arith.constant 0 : i32
    %c0_i32_1 = arith.constant 0 : i32
    return %c0_i32, %c0_i32_0 : i32, i32
  }
  func.func @transform_8(%arg0: i32) -> (i32, i32) {
    %c0_i32 = arith.constant 0 : i32
    %c0_i32_0 = arith.constant 0 : i32
    %c0_i32_1 = arith.constant 0 : i32
    return %c0_i32, %c0_i32_0 : i32, i32
  }
  func.func @transform_9(%arg0: i32) -> (i32, i32) {
    %c0_i32 = arith.constant 0 : i32
    %c0_i32_0 = arith.constant 0 : i32
    %c0_i32_1 = arith.constant 0 : i32
    return %c0_i32, %c0_i32_0 : i32, i32
  }
  func.func @transform_10(%arg0: i32) -> (i32, i32) {
    %c0_i32 = arith.constant 0 : i32
    %c0_i32_0 = arith.constant 0 : i32
    %c0_i32_1 = arith.constant 0 : i32
    return %c0_i32, %c0_i32_0 : i32, i32
  }
  func.func @transform_11(%arg0: i32) -> (i32, i32) {
    %c0_i32 = arith.constant 0 : i32
    %c0_i32_0 = arith.constant 0 : i32
    %c0_i32_1 = arith.constant 0 : i32
    return %c0_i32, %c0_i32_0 : i32, i32
  }
  func.func @transform_12(%arg0: i32) -> (i32, i32) {
    %c0_i32 = arith.constant 0 : i32
    %c0_i32_0 = arith.constant 0 : i32
    %c0_i32_1 = arith.constant 0 : i32
    return %c0_i32, %c0_i32_0 : i32, i32
  }
  func.func @transform_13(%arg0: i32) -> (i32, i32) {
    %c0_i32 = arith.constant 0 : i32
    %c0_i32_0 = arith.constant 0 : i32
    %c0_i32_1 = arith.constant 0 : i32
    return %c0_i32, %c0_i32_0 : i32, i32
  }
  func.func @transform_14(%arg0: i32) -> (i32, i32, i32) {
    %c0_i32 = arith.constant 0 : i32
    %c0_i32_0 = arith.constant 0 : i32
    %c0_i32_1 = arith.constant 0 : i32
    return %arg0, %c0_i32, %c0_i32_0 : i32, i32, i32
  }
}

</mosaic_0001>

<bundles_post_ra>
// kernel: tpu_custom_call.1
= control target key start
LH: loop header
LB: loop body
LE: loop exit
PB: predicated region body
PF: predicated region fallthrough
CT: control target
= control target key end

     0   :  { %s3271_s0 = inlined_call_operand.vmem [shape: f32[2,8,32], index: 0, kind: input, shape index: {}]   ;;  %s3272_s1 = inlined_call_operand.vmem [shape: f32[1,32], index: 1, kind: input, shape index: {}]   ;;  %s3273_s2 = inlined_call_operand.vmem [shape: f32[1,32], index: 2, kind: input, shape index: {}]   ;;  %s3274_s3 = inlined_call_operand.vmem [shape: bf16[32,64], index: 3, kind: input, shape index: {}]   ;;  %s3275_s4 = inlined_call_operand.vmem [shape: bf16[32,64], index: 4, kind: input, shape index: {}]   ;;  %s3276_s5 = inlined_call_operand.vmem [shape: bf16[32,64], index: 5, kind: input, shape index: {}]   ;;  %s3277_s6 = inlined_call_operand.vmem [shape: bf16[64,32], index: 6, kind: input, shape index: {}]   ;;  %s3278_s7 = inlined_call_operand.vmem [shape: f32[1,32], index: 7, kind: input, shape index: {}]   ;;  %s3279_s8 = inlined_call_operand.vmem [shape: f32[1,32], index: 8, kind: input, shape index: {}]   ;;  %s3280_s9 = inlined_call_operand.vmem [shape: f32[1,32], index: 9, kind: input, shape index: {}]   ;;  %s3281_s10 = inlined_call_operand.vmem [shape: bf16[32,64], index: 10, kind: input, shape index: {}]   ;;  %s3282_s11 = inlined_call_operand.vmem [shape: f32[1,64], index: 11, kind: input, shape index: {}]   ;;  %s3283_s12 = inlined_call_operand.vmem [shape: bf16[64,32], index: 12, kind: input, shape index: {}]   ;;  %s3284_s13 = inlined_call_operand.vmem [shape: f32[1,32], index: 13, kind: input, shape index: {}]   ;;  %s3285_s14 = inlined_call_operand.hbm [shape: f32[2,8,32], index: 14, kind: output, shape index: {}]  }
   0x1   :  { %3286 = sst [smem:[#allocation5_spill]] %s3271_s0 }
   0x2   :  { %3287 = sst [smem:[#allocation6_spill]] %s3272_s1 }
   0x3   :  { %3288 = sst [smem:[#allocation7_spill]] %s3273_s2 }
   0x4   :  { %3289 = sst [smem:[#allocation8_spill]] %s3274_s3 }
   0x5   :  { %19 = vsyncpa [#allocation3], 0 }
   0x6   :  { %21 = vsyncpa [#allocation3 + $0x1], 0  ;;  %s2921_s29 = smov 0   ;;  %s2923_s30 = smov 0  }
   0x7   :  { %s2925_s15 = smov 0   ;;  %s2927_s16 = smov 0  }
   0x8 LB: > { %s2942_s17 = sadd.s32 4294967295, %s2832_s16   ;;  %s2357_s18 = sadd.s32 4294967294, %s2832_s16   ;;  %s2832_s16 = sphi %s2927_s16, %s3299_s16   ;;  %s2828_s15 = sphi %s2925_s15, %s3298_s15   ;;  %s2824_s30 = sphi %s2923_s30, %s3297_s30   ;;  %s2820_s29 = sphi %s2921_s29, %s3296_s29  }
   0x9   : > { %s2946_s19 = sadd.s32 1, %s2832_s16   ;;  %s333_s20 = sadd.s32 1, %s2828_s15 }
   0xa   : > { %s330_s21 = ssub.s32 %s2832_s16, %s2946_s19  ;;  %p343_p0 = scmp.ne.s32.totalorder %s2828_s15, %s2824_s30 }
   0xb   : > { %p331_p1 = scmp.eq.s32.totalorder %s330_s21, 0  ;;  %p344_p2 = scmp.eq.s32.totalorder %s2942_s17, 1 }
   0xc   : > { %p349_p3 = scmp.ne.s32.totalorder %s2824_s30, %s2820_s29  ;;  %p350_p4 = scmp.eq.s32.totalorder %s2357_s18, 1 }
   0xd   : > { %s2957_s22 = scalar_select %p331_p1, %s2828_s15, %s333_s20  }
   0xe   : > { %p2959_p5 = por %p344_p2, %p343_p0  ;;  %p2963_p6 = por %p350_p4, %p349_p3 }
   0xf   : > { %p2360_p7 = scmp.ge.s32.totalorder %s2832_s16, 1  ;;  %p414_p8 = scmp.lt.s32.totalorder %s2832_s16, 3 }
  0x11   : > { %p415_p9 = pnand %p2360_p7, %p414_p8 }
  0x12   : > { %p459_p10 = scmp.lt.s32.totalorder (!%p415_p9), %s2942_s17, 1  ;;  %vm530_vm0 = vcmask (!%p415_p9), 261120   ;;  %s3292_s0 = sld [smem:[#allocation5_spill]] (!%p415_p9)  ;;  %v2409_v8 = vld [vmem:[%s3275_s4] sm:$0xff] (!%p415_p9)   ;;  %v2834_v9 = vmov (!%p415_p9), 0.0|0.0   ;;  %v2465_v11 = vld [vmem:[%s3275_s4 + $0x8] sm:$0xff] (!%p415_p9)   ;;  %v787_v32 = vlaneseq (!%p415_p9) }
  0x13   : > { %418 = sbr.rel (%p415_p9) target bundleno = 2487 (0x9b7), region = 76  ;;  %s3293_s3 = sld [smem:[#allocation8_spill]] (!%p415_p9)  ;;  %2650 = vmatprep.subr.bf16.mxu0 (!%p415_p9), %v2834_v9  ;;  %2656 = vmatprep.subr.bf16.mxu1 (!%p415_p9), %v2834_v9  ;;  %vm2835_vm1 = vmmov (!%p415_p9), 0   ;;  %v2836_v12 = vmov (!%p415_p9), 0.0   ;;  %v2417_v22 = vld [vmem:[%s3276_s5] sm:$0xff] (!%p415_p9)   ;;  %v2466_v23 = vld [vmem:[%s3276_s5 + $0x8] sm:$0xff] (!%p415_p9)  }
  0x14   : > { %2658 = vmatpush3.bf16.msra.mxu1 (!%p415_p9), %v2409_v8  ;;  %2536 = vmatprep.mubr.msk.f32.mxu0 (!%p415_p9), %vm2835_vm1, %v2836_v12  ;;  %s3294_s1 = sld [smem:[#allocation6_spill]] (!%p415_p9)  ;;  %s3295_s2 = sld [smem:[#allocation7_spill]] (!%p415_p9)  ;;  %v2840_v30 = vmov (!%p415_p9), 1983009808   ;;  %v2841_v33 = vmov (!%p415_p9), 1934713408  }
  0x15   : > { %2659 = vmatprep.subr.bf16.mxu1 (!%p415_p9), %v2834_v9  ;;  %2547 = vmatprep.mubr.msk.f32.mxu1 (!%p415_p9), %vm2835_vm1, %v2836_v12  ;;  %s2839_s27 = smov (!%p415_p9), 96   ;;  %v785_v31 = vunpack.c.l.s4 (!%p415_p9), %v2840_v30  ;;  %v817_v34 = vunpack.c.l.s4 (!%p415_p9), %v2841_v33  ;;  %v788_v36 = vshrl.u32 (!%p415_p9), %v787_v32, 7  ;;  %vm1210_vm2 = vcmask (!%p415_p9), 130048   ;;  %s2843_s20 = smov (!%p415_p9), 16  }
  0x16   : > { %vm1515_vm3 = vcmask (!%p415_p9), 64512   ;;  %s2844_s21 = smov (!%p415_p9), 48   ;;  %vm2002_vm4 = vcmask (!%p415_p9), 392192   ;;  %vm2004_vm5 = vcmask (!%p415_p9), 523264  }
  0x17   : > { %v786_v35 = vunpack.c.0.s8 (!%p415_p9), %v785_v31  ;;  %v818_v39 = vunpack.c.0.s8 (!%p415_p9), %v817_v34 }
  0x18   : > { %2661 = vmatpush3.bf16.msra.mxu1 (!%p415_p9), %v2465_v11 }
  0x19   : > { %v2401_v7 = vld [vmem:[%s3293_s3] sm:$0xff] (!%p415_p9)   ;;  %v2464_v10 = vld [vmem:[%s3293_s3 + $0x8] sm:$0xff] (!%p415_p9)   ;;  %2566 = vmatprep.subr.mxu1 (!%p415_p9), %v2836_v12  ;;  %v3038_v40 = vsub.s32 (!%p415_p9), %v786_v35, %v788_v36  ;;  %v3040_v46 = vsub.s32 (!%p415_p9), %v818_v39, %v788_v36 }
  0x1a   : > { %s460_s25 = scalar_select %p459_p10, %s2942_s17, 1  ;;  %2652 = vmatpush3.bf16.msra.mxu0 %v2401_v7  ;;  %v2363_v17 = vld [vmem:[%s3294_s1] ss:$0 sm:$0xff] }
  0x1b   : > { %2653 = vmatprep.subr.bf16.mxu0 %v2834_v9  ;;  %v2364_v19 = vld [vmem:[%s3295_s2] ss:$0 sm:$0xff] }
  0x1c   : > { %s2362_s26 = sshll.u32 %s460_s25, 3  ;;  %s2837_s25 = smov 80  }
  0x1d   : > { %s462_s18 = scalar_lea.vmem %s3292_s0, %s2362_s26  ;;  %s2838_s26 = smov 112  }
  0x1e   : > { %v2974_v0 = vld [vmem:[%s462_s18] sm:$0xff]  ;;  %2655 = vmatpush3.bf16.msra.mxu0 %v2464_v10  ;;  %s2842_s18 = smov 32   ;;  %s2397_s0 = sshll.u32 %s2942_s17, 7 }
  0x1f   : > { %v531_v1 = vsel %vm530_vm0, %v2974_v0, 0.0  ;;  %2662 = vmatprep.subr.bf16.mxu0 %v2834_v9  ;;  %s3228_s2 = scalar_lea.hbm %s3285_s14, %s2397_s0  ;;  %s2845_s17 = smov [#allocation2]  }
  0x20   : > { %532 = vadd.xlane.f32.xlu0 %v531_v1 }
  0xad   : > { %v533_v2 = vpop.xlane.xlu0 %532 }
  0xae   : > { %v535_v3 = vmul.f32 0.03125, %v533_v2 }
  0xb0   : > { %v536_v4 = vsub.f32 %v2974_v0, %v535_v3 }
  0xb2   : > { %v537_v5 = vmul.f32 %v536_v4, %v536_v4 }
  0xb4   : > { %v538_v6 = vsel %vm530_vm0, %v537_v5, 0.0 }
  0xb5   : > { %539 = vadd.xlane.f32.xlu0 %v538_v6 }
 0x142   : > { %v540_v13 = vpop.xlane.xlu0 %539 }
 0x143   : > { %v541_v14 = vmul.f32 0.03125, %v540_v13 }
 0x145   : > { %v542_v15 = vadd.f32 1e-05, %v541_v14 }
 0x147   : > { %2748 = vrsqrt.f32 %v542_v15 }
 0x151   : > { %v2749_v16 = vpop.eup %2748 }
 0x152   : > { %v544_v18 = vmul.f32 %v2749_v16, %v536_v4 }
 0x154   : > { %v551_v20 = vmul.f32 %v2363_v17, %v544_v18 }
 0x156   : > { %v558_v21 = vadd.f32 %v2364_v19, %v551_v20 }
 0x158   : > { %2537 = vmatmul.mubr.msk.f32.vlgmr.msra.gmra.mrb[0].mxu0 %vm530_vm0, %v558_v21  ;;  %2548 = vmatmul.mubr.msk.f32.vlgmr.msra.gmra.mrb[0].mxu1 %vm530_vm0, %v558_v21 }
 0x159   : > { %2664 = vmatpush3.bf16.msra.mxu0 %v2417_v22  ;;  %2558 = vmatprep.mubr.msk.f32.mxu0 %vm2835_vm1, %v2836_v12 }
 0x15a   : > { %2665 = vmatprep.subr.bf16.mxu0 %v2834_v9  ;;  %2568 = vmatprep.mubr.msk.f32.mxu1 %vm2835_vm1, %v2836_v12 }
 0x15d   : > { %2667 = vmatpush3.bf16.msra.mxu0 %v2466_v23 }
 0x15e   : > { %2561 = vmatprep.subr.mxu0 %v2836_v12 }
 0x160   : > { %2559 = vmatmul.mubr.msk.f32.vlgmr.msra.gmra.mrb[2].mxu0 %vm530_vm0, %v558_v21 }
 0x161   : > { %2563 = vmatprep.mubr.msk.f32.mxu0 %vm2835_vm1, %v2836_v12 }
 0x22b   : > { %v3025_v24 = vpop.f32.mrb[0].mxu0  ;;  %v698_v25 = vpop.f32.mrb[0].mxu1 }
 0x22c   : > { %925 = vrot.lane.b32.xlu0 %v698_v25, %s2837_s25  ;;  %919 = vrot.lane.b32.xlu1 %v698_v25, %s2838_s26  ;;  %v2538_v26 = vpop.f32.mrb[1].mxu0  ;;  %v2549_v27 = vpop.f32.mrb[1].mxu1 }
 0x230   : > { %922 = vrot.lane.b32.xlu1 %v698_v25, %s2839_s27 }
 0x233   : > { %v3030_v28 = vpop.f32.mrb[2].mxu0 }
 0x234   : > { %v2560_v29 = vpop.f32.mrb[3].mxu0  ;;  %773 = vrot.lane.b32.xlu1 %v3025_v24, %s2838_s26 }
 0x238   : > { %776 = vrot.lane.b32.xlu1 %v3025_v24, %s2839_s27 }
 0x23c   : > { %779 = vrot.lane.b32.xlu1 %v3025_v24, %s2837_s25 }
 0x29e   : > { %v926_v37 = vpop.permute.xlu0 %925  ;;  %v920_v38 = vpop.permute.xlu1 %919 }
 0x29f   : > { %v944_v41 = vcombine.low %v920_v38, %v926_v37  ;;  %v945_v42 = vcombine.high %v920_v38, %v926_v37 }
 0x2a1   : > { %v952_v47 = vrot.slane %v944_v41, %v3038_v40  ;;  %v959_v48 = vrot.slane %v945_v42, %v3038_v40 }
 0x2a2   : > { %v923_v43 = vpop.permute.xlu1 %922 }
 0x2a3   : > { %v928_v44 = vcombine.low %v698_v25, %v923_v43  ;;  %v929_v45 = vcombine.high %v698_v25, %v923_v43 }
 0x2a5   : > { %v936_v49 = vrot.slane %v928_v44, %v3038_v40  ;;  %v943_v50 = vrot.slane %v929_v45, %v3038_v40 }
 0x2a6   : > { %v774_v51 = vpop.permute.xlu1 %773 }
 0x2a7   : > { %v960_v52 = vcombine.low %v936_v49, %v952_v47  ;;  %v961_v53 = vcombine.high %v936_v49, %v952_v47  ;;  %v976_v54 = vcombine.low %v943_v50, %v959_v48  ;;  %v977_v55 = vcombine.high %v943_v50, %v959_v48 }
 0x2a9   : > { %v968_v56 = vrot.slane %v960_v52, %v3040_v46  ;;  %v975_v57 = vrot.slane %v961_v53, %v3040_v46  ;;  %v984_v58 = vrot.slane %v976_v54, %v3040_v46  ;;  %v991_v59 = vrot.slane %v977_v55, %v3040_v46 }
 0x2aa   : > { %v777_v60 = vpop.permute.xlu1 %776 }
 0x2ab   : > { %v996_v61 = vcombine.low %v968_v56, %v975_v57  ;;  %v2370_v62 = vcombine.high %v968_v56, %v975_v57  ;;  %v1012_v63 = vcombine.low %v984_v58, %v991_v59  ;;  %v2371_v1 = vcombine.high %v984_v58, %v991_v59 }
 0x2ac   : > { %v782_v6 = vcombine.low %v3025_v24, %v777_v60  ;;  %v783_v7 = vcombine.high %v3025_v24, %v777_v60 }
 0x2ad   : > { %v1003_v2 = vrot.slane %v996_v61, %v3038_v40  ;;  %v1011_v3 = vrot.slane %v2370_v62, %v3038_v40  ;;  %v1019_v4 = vrot.slane %v1012_v63, %v3038_v40  ;;  %v1027_v5 = vrot.slane %v2371_v1, %v3038_v40 }
 0x2ae   : > { %v780_v8 = vpop.permute.xlu1 %779  ;;  %v790_v17 = vrot.slane %v782_v6, %v3038_v40  ;;  %v797_v18 = vrot.slane %v783_v7, %v3038_v40 }
 0x2af   : > { %v1028_v10 = vcombine.low %v1003_v2, %v1011_v3  ;;  %v1044_v11 = vcombine.low %v1019_v4, %v1027_v5  ;;  %v798_v13 = vcombine.low %v774_v51, %v780_v8  ;;  %v799_v14 = vcombine.high %v774_v51, %v780_v8 }
 0x2b0   : > { %v1029_v36 = vcombine.high %v1003_v2, %v1011_v3  ;;  %v1045_v37 = vcombine.high %v1019_v4, %v1027_v5 }
 0x2b1   : > { %v1036_v15 = vrot.slane %v1028_v10, %v3040_v46  ;;  %v1052_v16 = vrot.slane %v1044_v11, %v3040_v46  ;;  %v806_v19 = vrot.slane %v798_v13, %v3038_v40  ;;  %v813_v20 = vrot.slane %v799_v14, %v3038_v40 }
 0x2b2   : > { %v1043_v48 = vrot.slane %v1029_v36, %v3040_v46  ;;  %v1059_v49 = vrot.slane %v1045_v37, %v3040_v46 }
 0x2b3   : > { %v1060_v21 = vcombine.low %v1036_v15, %v1052_v16  ;;  %v1061_v22 = vcombine.high %v1036_v15, %v1052_v16  ;;  %v814_v23 = vcombine.low %v790_v17, %v806_v19  ;;  %v815_v24 = vcombine.high %v790_v17, %v806_v19 }
 0x2b4   : > { %v830_v25 = vcombine.low %v797_v18, %v813_v20  ;;  %v831_v26 = vcombine.high %v797_v18, %v813_v20  ;;  %v1062_v56 = vcombine.low %v1043_v48, %v1059_v49  ;;  %v1063_v57 = vcombine.high %v1043_v48, %v1059_v49 }
 0x2b5   : > { %2562 = vmatpush3.xpose.msk.msra.mxu0 %vm1210_vm2, %v1060_v21  ;;  %2567 = vmatpush3.xpose.msk.msra.mxu1 %vm1210_vm2, %v1061_v22  ;;  %v822_v27 = vrot.slane %v814_v23, %v3040_v46  ;;  %v829_v29 = vrot.slane %v815_v24, %v3040_v46 }
 0x2b6   : > { %v838_v30 = vrot.slane %v830_v25, %v3040_v46  ;;  %v845_v31 = vrot.slane %v831_v26, %v3040_v46  ;;  %2571 = vmatprep.subr.mxu0 %v2836_v12  ;;  %2576 = vmatprep.subr.mxu1 %v2836_v12 }
 0x2b7   : > { %v850_v32 = vcombine.low %v822_v27, %v829_v29  ;;  %v2368_v33 = vcombine.high %v822_v27, %v829_v29 }
 0x2b8   : > { %v866_v34 = vcombine.low %v838_v30, %v845_v31  ;;  %v2369_v35 = vcombine.high %v838_v30, %v845_v31 }
 0x2b9   : > { %v857_v38 = vrot.slane %v850_v32, %v3038_v40  ;;  %v865_v39 = vrot.slane %v2368_v33, %v3038_v40 }
 0x2ba   : > { %v873_v41 = vrot.slane %v866_v34, %v3038_v40  ;;  %v881_v42 = vrot.slane %v2369_v35, %v3038_v40 }
 0x2bb   : > { %v882_v43 = vcombine.low %v857_v38, %v865_v39  ;;  %v883_v44 = vcombine.high %v857_v38, %v865_v39 }
 0x2bc   : > { %v898_v45 = vcombine.low %v873_v41, %v881_v42  ;;  %v899_v47 = vcombine.high %v873_v41, %v881_v42 }
 0x2bd   : > { %v890_v50 = vrot.slane %v882_v43, %v3040_v46  ;;  %v897_v54 = vrot.slane %v883_v44, %v3040_v46 }
 0x2be   : > { %v906_v51 = vrot.slane %v898_v45, %v3040_v46  ;;  %v913_v55 = vrot.slane %v899_v47, %v3040_v46 }
 0x2c0   : > { %v914_v52 = vcombine.low %v890_v50, %v906_v51  ;;  %v915_v53 = vcombine.high %v890_v50, %v906_v51  ;;  %v916_v58 = vcombine.low %v897_v54, %v913_v55  ;;  %v917_v59 = vcombine.high %v897_v54, %v913_v55 }
 0x2c2   : > { %2564 = vmatmul.mubr.msk.f32.vlgmr.msra.gmra.mrb[4].mxu0 %vm1210_vm2, %v914_v52  ;;  %2569 = vmatmul.mubr.msk.f32.vlgmr.msra.gmra.mrb[2].mxu1 %vm1210_vm2, %v915_v53 }
 0x2c3   : > { %2572 = vmatpush3.xpose.msk.msra.mxu0 %vm1210_vm2, %v1062_v56  ;;  %2577 = vmatpush3.xpose.msk.msra.mxu1 %vm1210_vm2, %v1063_v57 }
 0x2c4   : > { %2573 = vmatprep.mubr.msk.f32.mxu0 %vm2835_vm1, %v2836_v12  ;;  %2578 = vmatprep.mubr.msk.f32.mxu1 %vm2835_vm1, %v2836_v12 }
 0x2c5   : > { %2581 = vmatprep.subr.mxu0 %v2836_v12  ;;  %2586 = vmatprep.subr.mxu1 %v2836_v12 }
 0x2c6   : > { %2574 = vmatmul.mubr.msk.f32.vlgmr.msra.gmra.mrb[6].mxu0 %vm1210_vm2, %v916_v58  ;;  %2579 = vmatmul.mubr.msk.f32.vlgmr.msra.gmra.mrb[4].mxu1 %vm1210_vm2, %v917_v59 }
 0x2c7   : > { %2583 = vmatprep.mubr.msk.f32.mxu0 %vm2835_vm1, %v2836_v12  ;;  %2588 = vmatprep.mubr.msk.f32.mxu1 %vm2835_vm1, %v2836_v12 }
 0x395   : > { %v1283_v60 = vpop.f32.mrb[4].mxu0  ;;  %v1359_v61 = vpop.f32.mrb[2].mxu1 }
 0x396   : > { %v2565_v62 = vpop.f32.mrb[5].mxu0  ;;  %v2570_v63 = vpop.f32.mrb[3].mxu1  ;;  %v1519_v1 = vsel %vm1515_vm3, %v1359_v61, -inf  ;;  %v1516_v2 = vsel %vm1515_vm3, %v1283_v60, -inf }
 0x397   : > { %1520 = vmax.xlane.f32.xlu0 %v1519_v1  ;;  %1517 = vmax.xlane.f32.xlu1 %v1516_v2 }
 0x399   : > { %v1435_v3 = vpop.f32.mrb[6].mxu0  ;;  %v1511_v4 = vpop.f32.mrb[4].mxu1 }
 0x39a   : > { %v2575_v5 = vpop.f32.mrb[7].mxu0  ;;  %v2580_v6 = vpop.f32.mrb[5].mxu1  ;;  %v1522_v7 = vsel %vm1515_vm3, %v1435_v3, -inf  ;;  %v1525_v8 = vsel %vm1515_vm3, %v1511_v4, -inf }
 0x3a8   : > { %1068 = vrot.lane.b32.xlu1 %v3030_v28, %s2839_s27 }
 0x3ad   : > { %1065 = vrot.lane.b32.xlu0 %v3030_v28, %s2838_s26 }
 0x3cc   : > { %1523 = vmax.xlane.f32.xlu1 %v1522_v7 }
 0x3d0   : > { %1526 = vmax.xlane.f32.xlu1 %v1525_v8 }
 0x3e1   : > { %1071 = vrot.lane.b32.xlu1 %v3030_v28, %s2837_s25 }
 0x424   : > { %v1521_v10 = vpop.xlane.xlu0 %1520  ;;  %v1518_v11 = vpop.xlane.xlu1 %1517 }
 0x425   : > { %v1529_v13 = vsub.f32 %v1359_v61, %v1521_v10  ;;  %v1528_v14 = vsub.f32 %v1283_v60, %v1518_v11  ;;  %v2425_v10 = vld [vmem:[%s3277_s6] sm:$0xff]   ;;  %v2467_v11 = vld [vmem:[%s3277_s6 + $0x8] sm:$0xff]  }
 0x427   : > { %v1534_v15 = vmul.f32 1.442695, %v1529_v13  ;;  %v1532_v16 = vmul.f32 1.442695, %v1528_v14  ;;  %v2468_v13 = vld [vmem:[%s3277_s6 + $0x10] sm:$0xff]  }
 0x428   : > { %v1069_v21 = vpop.permute.xlu1 %1068  ;;  %v1066_v31 = vpop.permute.xlu0 %1065 }
 0x429   : > { %2750 = vpow2.f32 %v1534_v15  ;;  %v1074_v27 = vcombine.low %v3030_v28, %v1069_v21  ;;  %v1075_v29 = vcombine.high %v3030_v28, %v1069_v21 }
 0x42a   : > { %2752 = vpow2.f32 %v1532_v16 }
 0x42b   : > { %v1082_v35 = vrot.slane %v1074_v27, %v3038_v40  ;;  %v1089_v36 = vrot.slane %v1075_v29, %v3038_v40 }
 0x433   : > { %v2751_v17 = vpop.eup %2750 }
 0x434   : > { %v2753_v18 = vpop.eup %2752  ;;  %v1543_v19 = vsel %vm1515_vm3, %v2751_v17, 0.0 }
 0x435   : > { %v1540_v20 = vsel %vm1515_vm3, %v2753_v18, 0.0  ;;  %1544 = vadd.xlane.f32.xlu1 %v1543_v19 }
 0x436   : > { %1541 = vadd.xlane.f32.xlu0 %v1540_v20 }
 0x459   : > { %v1524_v22 = vpop.xlane.xlu1 %1523 }
 0x45a   : > { %v1530_v23 = vsub.f32 %v1435_v3, %v1524_v22 }
 0x45c   : > { %v1536_v24 = vmul.f32 1.442695, %v1530_v23 }
 0x45d   : > { %v1527_v25 = vpop.xlane.xlu1 %1526 }
 0x45e   : > { %2754 = vpow2.f32 %v1536_v24  ;;  %v1531_v26 = vsub.f32 %v1511_v4, %v1527_v25 }
 0x460   : > { %v1538_v30 = vmul.f32 1.442695, %v1531_v26 }
 0x461   : > { %v1072_v32 = vpop.permute.xlu1 %1071 }
 0x462   : > { %2756 = vpow2.f32 %v1538_v30  ;;  %v1090_v33 = vcombine.low %v1066_v31, %v1072_v32  ;;  %v1091_v34 = vcombine.high %v1066_v31, %v1072_v32 }
 0x464   : > { %v1098_v37 = vrot.slane %v1090_v33, %v3038_v40  ;;  %v1105_v38 = vrot.slane %v1091_v34, %v3038_v40 }
 0x466   : > { %v1106_v39 = vcombine.low %v1082_v35, %v1098_v37  ;;  %v1107_v41 = vcombine.high %v1082_v35, %v1098_v37  ;;  %v1122_v42 = vcombine.low %v1089_v36, %v1105_v38  ;;  %v1123_v43 = vcombine.high %v1089_v36, %v1105_v38 }
 0x468   : > { %v2755_v44 = vpop.eup %2754  ;;  %v1114_v28 = vrot.slane %v1106_v39, %v3040_v46  ;;  %v1121_v45 = vrot.slane %v1107_v41, %v3040_v46  ;;  %v1130_v47 = vrot.slane %v1122_v42, %v3040_v46  ;;  %v1137_v48 = vrot.slane %v1123_v43, %v3040_v46 }
 0x469   : > { %v1546_v49 = vsel %vm1515_vm3, %v2755_v44, 0.0 }
 0x46a   : > { %v1142_v50 = vcombine.low %v1114_v28, %v1121_v45  ;;  %v2372_v51 = vcombine.high %v1114_v28, %v1121_v45  ;;  %v1158_v52 = vcombine.low %v1130_v47, %v1137_v48  ;;  %v2373_v53 = vcombine.high %v1130_v47, %v1137_v48  ;;  %1547 = vadd.xlane.f32.xlu0 %v1546_v49  ;;  %v2469_v48 = vld [vmem:[%s3277_s6 + $0x18] sm:$0xff]  }
 0x46c   : > { %v2757_v54 = vpop.eup %2756  ;;  %v1149_v55 = vrot.slane %v1142_v50, %v3038_v40  ;;  %v1157_v56 = vrot.slane %v2372_v51, %v3038_v40  ;;  %v1165_v57 = vrot.slane %v1158_v52, %v3038_v40  ;;  %v1173_v58 = vrot.slane %v2373_v53, %v3038_v40 }
 0x46d   : > { %v1549_v59 = vsel %vm1515_vm3, %v2757_v54, 0.0 }
 0x46e   : > { %1550 = vadd.xlane.f32.xlu0 %v1549_v59  ;;  %v1174_v60 = vcombine.low %v1149_v55, %v1157_v56  ;;  %v1190_v61 = vcombine.low %v1165_v57, %v1173_v58  ;;  %v1175_v62 = vcombine.high %v1149_v55, %v1157_v56  ;;  %v1191_v63 = vcombine.high %v1165_v57, %v1173_v58 }
 0x470   : > { %v1182_v1 = vrot.slane %v1174_v60, %v3040_v46  ;;  %v1198_v2 = vrot.slane %v1190_v61, %v3040_v46  ;;  %v1189_v3 = vrot.slane %v1175_v62, %v3040_v46  ;;  %v1205_v4 = vrot.slane %v1191_v63, %v3040_v46 }
 0x472   : > { %v1206_v5 = vcombine.low %v1182_v1, %v1198_v2  ;;  %v1207_v6 = vcombine.high %v1182_v1, %v1198_v2  ;;  %v1208_v7 = vcombine.low %v1189_v3, %v1205_v4  ;;  %v1209_v8 = vcombine.high %v1189_v3, %v1205_v4 }
 0x474   : > { %2582 = vmatpush3.msra.mxu0 %v1206_v5  ;;  %2587 = vmatpush3.msra.mxu1 %v1207_v6 }
 0x475   : > { %2584 = vmatmul.mubr.msk.f32.vlgmr.msra.gmra.mrb[8].mxu0 %vm1515_vm3, %v2753_v18  ;;  %2589 = vmatmul.mubr.msk.f32.vlgmr.msra.gmra.mrb[6].mxu1 %vm1515_vm3, %v2751_v17 }
 0x476   : > { %2591 = vmatprep.subr.mxu0 %v2836_v12  ;;  %2596 = vmatprep.subr.mxu1 %v2836_v12 }
 0x477   : > { %2592 = vmatpush3.msra.mxu0 %v1208_v7  ;;  %2597 = vmatpush3.msra.mxu1 %v1209_v8 }
 0x478   : > { %2593 = vmatprep.mubr.msk.f32.mxu0 %vm2835_vm1, %v2836_v12  ;;  %2598 = vmatprep.mubr.msk.f32.mxu1 %vm2835_vm1, %v2836_v12 }
 0x479   : > { %2594 = vmatmul.mubr.msk.f32.vlgmr.msra.gmra.mrb[10].mxu0 %vm1515_vm3, %v2755_v44  ;;  %2599 = vmatmul.mubr.msk.f32.vlgmr.msra.gmra.mrb[8].mxu1 %vm1515_vm3, %v2757_v54 }
 0x47a   : > { %2668 = vmatprep.subr.bf16.mxu0 %v2834_v9  ;;  %2617 = vmatprep.mubr.msk.f32.mxu0 %vm2835_vm1, %v2836_v12 }
 0x47b   : > { %2680 = vmatprep.subr.bf16.mxu1 %v2834_v9  ;;  %2628 = vmatprep.mubr.msk.f32.mxu1 %vm2835_vm1, %v2836_v12 }
 0x47c   : > { %2670 = vmatpush3.bf16.msra.mxu0 %v2425_v10 }
 0x47d   : > { %2671 = vmatprep.subr.bf16.mxu0 %v2834_v9 }
 0x480   : > { %2673 = vmatpush3.bf16.msra.mxu0 %v2467_v11 }
 0x481   : > { %2674 = vmatprep.subr.bf16.mxu0 %v2834_v9 }
 0x484   : > { %2676 = vmatpush3.bf16.msra.mxu0 %v2468_v13 }
 0x485   : > { %2677 = vmatprep.subr.bf16.mxu0 %v2834_v9 }
 0x488   : > { %2679 = vmatpush3.bf16.msra.mxu0 %v2469_v48 }
 0x4c2   : > { %v1545_v16 = vpop.xlane.xlu1 %1544 }
 0x4c3   : > { %v1542_v14 = vpop.xlane.xlu0 %1541  ;;  %2758 = vrcp.f32 %v1545_v16 }
 0x4c4   : > { %2760 = vrcp.f32 %v1542_v14 }
 0x4cd   : > { %v2759_v20 = vpop.eup %2758 }
 0x4ce   : > { %v2761_v23 = vpop.eup %2760 }
 0x4f7   : > { %v1548_v15 = vpop.xlane.xlu0 %1547 }
 0x4f8   : > { %2762 = vrcp.f32 %v1548_v15 }
 0x4fb   : > { %v1551_v17 = vpop.xlane.xlu0 %1550 }
 0x4fc   : > { %2764 = vrcp.f32 %v1551_v17  ;;  %v2389_v17 = vld [vmem:[%s3278_s7] ss:$0 sm:$0xff] }
 0x502   : > { %v2763_v24 = vpop.eup %2762 }
 0x506   : > { %v2765_v25 = vpop.eup %2764 }
 0x548   : > { %v1621_v18 = vpop.f32.mrb[8].mxu0  ;;  %v1694_v19 = vpop.f32.mrb[6].mxu1 }
 0x549   : > { %v2585_v21 = vpop.f32.mrb[9].mxu0  ;;  %v2590_v22 = vpop.f32.mrb[7].mxu1  ;;  %v1848_v29 = vmul.f32 %v2761_v23, %v1621_v18  ;;  %v1849_v30 = vmul.f32 %v2759_v20, %v1694_v19 }
 0x54c   : > { %v1767_v26 = vpop.f32.mrb[10].mxu0  ;;  %v1840_v27 = vpop.f32.mrb[8].mxu1 }
 0x54d   : > { %v1850_v31 = vmul.f32 %v2763_v24, %v1767_v26  ;;  %v1851_v32 = vmul.f32 %v2765_v25, %v1840_v27  ;;  %v2595_v33 = vpop.f32.mrb[11].mxu0  ;;  %v2600_v34 = vpop.f32.mrb[9].mxu1  ;;  %v2441_v27 = vld [vmem:[%s3281_s10] sm:$0xff]  }
 0x54e   : > { %2682 = vmatpush3.bf16.msra.mxu1 %v2441_v27  ;;  %v2390_v33 = vld [vmem:[%s3279_s8] ss:$0 sm:$0xff] }
 0x54f   : > { %v1852_v35 = vcombine.low %v1848_v29, %v1850_v31  ;;  %v1853_v36 = vcombine.high %v1848_v29, %v1850_v31  ;;  %v1868_v37 = vcombine.low %v1849_v30, %v1851_v32  ;;  %v1869_v38 = vcombine.high %v1849_v30, %v1851_v32  ;;  %2683 = vmatprep.subr.bf16.mxu1 %v2834_v9 }
 0x551   : > { %v1860_v39 = vrot.slane %v1852_v35, %v3038_v40  ;;  %v1867_v41 = vrot.slane %v1853_v36, %v3038_v40  ;;  %v1876_v42 = vrot.slane %v1868_v37, %v3038_v40  ;;  %v1883_v43 = vrot.slane %v1869_v38, %v3038_v40  ;;  %v2391_v35 = vld [vmem:[%s3280_s9] ss:$0 sm:$0xff] }
 0x552   : > { %v2449_v38 = vld [vmem:[%s3283_s12] sm:$0xff]  }
 0x553   : > { %v1884_v44 = vcombine.low %v1860_v39, %v1876_v42  ;;  %v1885_v28 = vcombine.high %v1860_v39, %v1876_v42  ;;  %v1900_v45 = vcombine.low %v1867_v41, %v1883_v43  ;;  %v1901_v47 = vcombine.high %v1867_v41, %v1883_v43  ;;  %v2471_v39 = vld [vmem:[%s3283_s12 + $0x8] sm:$0xff]   ;;  %v2472_v41 = vld [vmem:[%s3283_s12 + $0x10] sm:$0xff]   ;;  %v2392_v42 = vld [vmem:[%s3282_s11] ss:$0 sm:$0xff] }
 0x555   : > { %v1892_v49 = vrot.slane %v1884_v44, %v3040_v46  ;;  %v1899_v50 = vrot.slane %v1885_v28, %v3040_v46  ;;  %v1908_v51 = vrot.slane %v1900_v45, %v3040_v46  ;;  %v1915_v52 = vrot.slane %v1901_v47, %v3040_v46 }
 0x557   : > { %v1920_v53 = vcombine.low %v1892_v49, %v1899_v50  ;;  %v2386_v54 = vcombine.high %v1892_v49, %v1899_v50  ;;  %v1936_v55 = vcombine.low %v1908_v51, %v1915_v52  ;;  %v2387_v56 = vcombine.high %v1908_v51, %v1915_v52  ;;  %v2395_v51 = vld [vmem:[%s3284_s13] ss:$0 sm:$0xff] }
 0x559   : > { %v1927_v57 = vrot.slane %v1920_v53, %v3038_v40  ;;  %v1935_v58 = vrot.slane %v2386_v54, %v3038_v40  ;;  %v1943_v59 = vrot.slane %v1936_v55, %v3038_v40  ;;  %v1951_v60 = vrot.slane %v2387_v56, %v3038_v40 }
 0x55b   : > { %v1953_v61 = vcombine.high %v1927_v57, %v1935_v58  ;;  %v1969_v62 = vcombine.high %v1943_v59, %v1951_v60  ;;  %v1952_v63 = vcombine.low %v1927_v57, %v1935_v58  ;;  %v1968_v1 = vcombine.low %v1943_v59, %v1951_v60 }
 0x55d   : > { %v1967_v2 = vrot.slane %v1953_v61, %v3040_v46  ;;  %v1983_v3 = vrot.slane %v1969_v62, %v3040_v46  ;;  %v1960_v4 = vrot.slane %v1952_v63, %v3040_v46  ;;  %v1976_v5 = vrot.slane %v1968_v1, %v3040_v46 }
 0x55f   : > { %v1986_v6 = vcombine.low %v1967_v2, %v1983_v3  ;;  %v1985_v7 = vcombine.high %v1960_v4, %v1976_v5  ;;  %v1987_v8 = vcombine.high %v1967_v2, %v1983_v3  ;;  %v1984_v10 = vcombine.low %v1960_v4, %v1976_v5 }
 0x561   : > { %1993 = vrot.lane.b32.xlu0 %v1986_v6, %s2842_s18  ;;  %1989 = vrot.lane.b32.xlu1 %v1985_v7, %s2843_s20  ;;  %s456_s20 = sand.u32 1, %s2824_s30  }
 0x562   : > { %s2285_s25 = scalar_lea.sflag [#allocation3], %s456_s20 }
 0x565   : > { %1997 = vrot.lane.b32.xlu1 %v1987_v8, %s2844_s21  ;;  %s2361_s21 = sshll.u32 %s456_s20, 3 }
 0x566   : > { %s458_s27 = scalar_lea.vmem [#allocation2], %s2361_s21  ;;  %s2774_s21 = sshll.u32 %s2845_s17, 4  ;;  %s2775_s21 = int_to_ptr.vmem [resolvable:$false] %s2774_s21 }
 0x567   : > { %s2298_s28 = sshll.u32 %s458_s27, 4  ;;  %s2776_s3 = scalar_lea.vmem %s2775_s21, 256  ;;  %s3230_s28 = int_to_ptr.vmem [resolvable:$true] %s2298_s28 }
 0x568   : > { %s2770_s26 = scalar_lea.vmem %s3230_s28, 128  ;;  %p2777_p0 = scmp.lt.s32.totalorder %s3230_s28, %s2775_s21 }
 0x569   : > { %p2771_p11 = scmp.ne.s32.totalorder %s3230_s28, %s2770_s26  ;;  %p2778_p1 = scmp.lt.s32.totalorder %s2776_s3, %s2770_s26 }
 0x56b   : > { %p2772_p12 = pnand %p2771_p11, %p2959_p5  ;;  %p2779_p2 = por %p2778_p1, %p2777_p0 }
 0x56d   : > { %p2773_p13 = pneg %p2772_p12 }
 0x56f   : > { %p2780_p3 = pnand %p2779_p2, %p2773_p13 }
 0x5d3   : > { %v1990_v40 = vpop.permute.xlu1 %1989  ;;  %v1994_v11 = vpop.permute.xlu0 %1993 }
 0x5d4   : > { %v2000_v13 = vsel %vm1210_vm2, %v1984_v10, %v1990_v40 }
 0x5d5   : > { %v2001_v15 = vsel %vm530_vm0, %v2000_v13, %v1994_v11 }
 0x5d7   : > { %v1998_v14 = vpop.permute.xlu1 %1997 }
 0x5d8   : > { %v2003_v46 = vsel %vm2002_vm4, %v2001_v15, %v1998_v14 }
 0x5d9   : > { %2618 = vmatmul.mubr.msk.f32.vlgmr.msra.gmra.mrb[12].mxu0 %vm2004_vm5, %v2003_v46 }
 0x6ac   : > { %v2074_v16 = vpop.f32.mrb[12].mxu0 }
 0x6ad   : > { %v2078_v18 = vadd.f32 %v2074_v16, %v2974_v0  ;;  %v2619_v19 = vpop.f32.mrb[13].mxu0  ;;  %v2470_v0 = vld [vmem:[%s3281_s10 + $0x8] sm:$0xff]  }
 0x6ae   : > { %2685 = vmatpush3.bf16.msra.mxu1 %v2470_v0 }
 0x6af   : > { %v2086_v20 = vadd.f32 %v2389_v17, %v2078_v18  ;;  %2686 = vmatprep.subr.bf16.mxu1 %v2834_v9 }
 0x6b1   : > { %v2089_v21 = vsel %vm530_vm0, %v2086_v20, 0.0 }
 0x6b2   : > { %2090 = vadd.xlane.f32.xlu1 %v2089_v21 }
 0x73f   : > { %v2091_v22 = vpop.xlane.xlu1 %2090 }
 0x740   : > { %v2092_v23 = vmul.f32 0.03125, %v2091_v22 }
 0x742   : > { %v2093_v24 = vsub.f32 %v2086_v20, %v2092_v23 }
 0x744   : > { %v2094_v25 = vmul.f32 %v2093_v24, %v2093_v24 }
 0x746   : > { %v2095_v26 = vsel %vm530_vm0, %v2094_v25, 0.0 }
 0x747   : > { %2096 = vadd.xlane.f32.xlu0 %v2095_v26 }
 0x7d4   : > { %v2097_v29 = vpop.xlane.xlu0 %2096 }
 0x7d5   : > { %v2098_v30 = vmul.f32 0.03125, %v2097_v29 }
 0x7d7   : > { %v2099_v31 = vadd.f32 1e-05, %v2098_v30 }
 0x7d9   : > { %2766 = vrsqrt.f32 %v2099_v31 }
 0x7e3   : > { %v2767_v32 = vpop.eup %2766 }
 0x7e4   : > { %v2101_v34 = vmul.f32 %v2767_v32, %v2093_v24 }
 0x7e6   : > { %v2108_v36 = vmul.f32 %v2390_v33, %v2101_v34 }
 0x7e8   : > { %v2115_v37 = vadd.f32 %v2391_v35, %v2108_v36 }
 0x7ea   : > { %2629 = vmatmul.mubr.msk.f32.vlgmr.msra.gmra.mrb[10].mxu1 %vm530_vm0, %v2115_v37 }
 0x7eb   : > { %2647 = vmatprep.mubr.msk.f32.mxu1 %vm2835_vm1, %v2836_v12  ;;  %2688 = vmatpush3.bf16.msra.mxu1 %v2449_v38  ;;  %v2473_v12 = vld [vmem:[%s3283_s12 + $0x18] sm:$0xff]  }
 0x7ec   : > { %2689 = vmatprep.subr.bf16.mxu1 %v2834_v9 }
 0x7ef   : > { %2691 = vmatpush3.bf16.msra.mxu1 %v2471_v39 }
 0x7f0   : > { %2692 = vmatprep.subr.bf16.mxu1 %v2834_v9 }
 0x7f3   : > { %2694 = vmatpush3.bf16.msra.mxu1 %v2472_v41 }
 0x7f4   : > { %2695 = vmatprep.subr.bf16.mxu1 %v2834_v9 }
 0x7f7   : > { %2697 = vmatpush3.bf16.msra.mxu1 %v2473_v12 }
 0x8bd   : > { %v2192_v43 = vpop.f32.mrb[10].mxu1 }
 0x8be   : > { %v2193_v44 = vadd.f32 %v2392_v42, %v2192_v43  ;;  %v2630_v28 = vpop.f32.mrb[11].mxu1 }
 0x8c0   : > { %v2197_v45 = vmul.f32 0.70710677, %v2193_v44  ;;  %v2196_v48 = vmul.f32 0.5, %v2193_v44 }
 0x8c2   : > { %2768 = verf.f32 %v2197_v45 }
 0x8cc   : > { %v2769_v47 = vpop.eup %2768 }
 0x8cd   : > { %v2199_v49 = vadd.f32 1.0, %v2769_v47 }
 0x8cf   : > { %v2200_v50 = vmul.f32 %v2199_v49, %v2196_v48 }
 0x8d1   : > { %2648 = vmatmul.mubr.msk.f32.vlgmr.msra.gmra.mrb[12].mxu1 %vm2004_vm5, %v2200_v50 }
 0x9a4   : > { %v2270_v9 = vpop.f32.mrb[12].mxu1 }
 0x9a5   : > { %v2274_v52 = vadd.f32 %v2270_v9, %v2086_v20  ;;  %v2649_v53 = vpop.f32.mrb[13].mxu1 }
 0x9a7   : > { %v2282_v54 = vadd.f32 %v2395_v51, %v2274_v52 }
 0x9a9   : > { %2283 = vst.msk [vmem:[%s458_s27] sm:$0xff] %vm530_vm0, %v2282_v54 }
 0x9aa   : > { %2783 = shalt.err (!%p2780_p3)
}
 0x9ab   : > { %s2784_s1 = scalar_lea.hbm %s3228_s2, 128  ;;  %s2788_s27 = scalar_lea.hbm %s3285_s14, 256 }
 0x9ac   : > { %p2785_p4 = scmp.ne.s32.totalorder %s3228_s2, %s2784_s1  ;;  %p2789_p9 = scmp.lt.u32.totalorder %s3228_s2, %s3285_s14 }
 0x9ad   : > { %p2790_p10 = scmp.lt.u32.totalorder %s2788_s27, %s2784_s1  ;;  %p2792_p12 = scmp.lt.u32.totalorder %s2784_s1, %s3228_s2 }
 0x9ae   : > { %p2786_p7 = pnand %p2785_p4, %p2959_p5 }
 0x9af   : > { %p2791_p11 = por %p2790_p10, %p2789_p9 }
 0x9b0   : > { %p2787_p8 = pneg %p2786_p7 }
 0x9b1   : > { %p2793_p13 = por %p2792_p12, %p2791_p11 }
 0x9b3   : > { %p2794_p0 = pnand %p2793_p13, %p2787_p8 }
 0x9b5   : > { %2797 = shalt.err (!%p2794_p0)
}
 0x9b6   : > { %2698 = dma.vmem_to_hbm [thread:$0]  (%p2959_p5), %s3230_s28, 128, %s3228_s2, %s2285_s25  }
 0x9b7 PF: > { %p2704_p1 = scmp.ge.s32.totalorder %s2832_s16, 2  ;;  %s2310_s3 = sand.u32 1, %s2820_s29  }
 0x9b8   : > { %s2311_s26 = scalar_lea.sflag [#allocation3], %s2310_s3 }
 0x9b9   : > { %p2701_p2 = pnand %p2704_p1, %p2963_p6 }
 0x9bb   : > { %2815 = dma.done.wait (!%p2701_p2), %s2311_s26, 128  }
 0x9bc   : > { %2817 = vsyncadd (!%p2701_p2), %s2311_s26, 4294967168  ;;  %p24_p3 = scmp.ge.s32.totalorder %s2946_s19, 4   ;;  %s3296_s29 = smov %s2824_s30 }
 0x9bd   : > { %s3297_s30 = smov %s2828_s15  ;;  %s3298_s15 = smov %s2957_s22 }
 0x9be   : > { %s3299_s16 = smov %s2946_s19  ;;  %26 = sbr.rel (!%p24_p3) target bundleno = 8 (0x8), region = 111 }
 0x9c5   :  { %2316 = vsyncpa [#allocation3], 1 }
 0x9c6   :  { %2318 = vsyncpa [#allocation3 + $0x1], 1 }

</bundles_post_ra>
